<compile_context>
chip_gen: v7x
topology: tpu7x:2x2x1
jax: 0.10.0
libtpu: 0.0.40
codegen_flags: <defaults>
</compile_context>

<pallas_src>
import jax
import jax.numpy as jnp
from jax import lax
from jax.experimental import pallas as pl
from jax.experimental.pallas import tpu as pltpu


def _pick_hw_tile(HW, hw_tile, max_tile=8192):
    """Choose the spatial (lane) tile per grid step."""
    if hw_tile is not None:
        thw = hw_tile
    elif HW <= max_tile:
        thw = HW
    else:
        thw = HW
        for t in range(max_tile, 0, -128):          # largest lane-aligned divisor
            if HW % t == 0:
                thw = t
                break
    assert HW % thw == 0 and (thw == HW or thw % 128 == 0), \
        "hw_tile must divide H*W and be a multiple of 128 (or equal H*W)"
    return thw


def merge_model(x_nchw, mean, std, w1, b1, w2, b2, *,
                batch_tile=32, hw_tile=None, spatial_chunk=512):
    B, C, H, W = x_nchw.shape
    HW = H * W
    Chid = w1.shape[1]
    nclass = w2.shape[1]

    # ---- fold preprocess (normalization) into the 1x1-conv weights/bias (f32, tiny) ----
    inv_std = 1.0 / std.reshape(C).astype(jnp.float32)                       # (C,)
    mean_v = mean.reshape(C).astype(jnp.float32)
    w1_eff = w1.astype(jnp.float32) * inv_std[:, None]                       # (C, Chid)
    b1_eff = (b1.reshape(1, Chid).astype(jnp.float32)
              - ((mean_v * inv_std) @ w1.astype(jnp.float32)).reshape(1, Chid))
    # fold the 1/HW of the global-average-pool into the classifier weight
    w2_eff = w2.astype(jnp.float32) * (1.0 / float(HW))                      # (Chid, nclass)
    b2_eff = b2.reshape(1, nclass).astype(jnp.float32)

    # ---- layout: keep NCHW; free reshape to (B, C, HW) so HW is lane-dense.
    # No pad / no dtype cast here: zero extra HBM passes over the dominant tensor.
    x = x_nchw.reshape(B, C, HW)

    # ---- tiling ----
    thw = _pick_hw_tile(HW, hw_tile)
    n_hw = HW // thw
    chunk = min(spatial_chunk, thw)
    assert thw % chunk == 0 and (chunk == thw or chunk % 128 == 0), \
        "spatial_chunk must divide the HW tile and be a multiple of 128"
    n_chunks = thw // chunk

    Bt = B if B <= batch_tile else batch_tile
    grid_b = pl.cdiv(B, Bt)
    if grid_b > 1:
        assert Bt % 8 == 0, "batch_tile must be a multiple of 8 when it tiles the batch"
    Bp = grid_b * Bt          # output rows allocated; extra (garbage) rows sliced off

    def kernel(x_ref, w1_ref, b1_ref, w2_ref, b2_ref, o_ref, acc_ref):
        hw_i = pl.program_id(1)

        @pl.when(hw_i == 0)
        def _init():
            acc_ref[...] = jnp.zeros_like(acc_ref)

        w1v = w1_ref[...]          # (C, Chid)  f32, resident across the whole grid
        b1v = b1_ref[...]          # (1, Chid)  f32

        # ---- per-batch-row spatial streaming --------------------------------
        # For each chunk: MXU does the C->Chid contraction (K=C), VPU does
        # bias+ReLU, XLU does the spatial sum.  Per-chunk working set is
        # (chunk, Chid) f32 — the full (Bt, Chid, thw) hidden tensor never exists.
        def row_partial_sum(b):
            def one_chunk(start, acc):
                xc = x_ref[b, :, pl.ds(start, chunk)]                  # (C, chunk)
                h = lax.dot_general(
                    xc, w1v,
                    dimension_numbers=(((0,), (0,)), ((), ())),        # contract over C
                    preferred_element_type=jnp.float32)                # (chunk, Chid)
                h = jnp.maximum(h + b1v, 0.0)
                return acc + jnp.sum(h, axis=0, keepdims=True)         # (1, Chid)

            acc0 = jnp.zeros((1, Chid), jnp.float32)
            if n_chunks <= 8:                                          # static slices
                acc_val = acc0
                for j in range(n_chunks):
                    acc_val = one_chunk(j * chunk, acc_val)
                return acc_val

            def body(j, acc):
                return one_chunk(pl.multiple_of(j * chunk, chunk), acc)
            return lax.fori_loop(0, n_chunks, body, acc0)

        if Bt <= 16:                                                   # static row unroll
            for b in range(Bt):
                acc_ref[pl.ds(b, 1), :] += row_partial_sum(b)
        else:                                                          # rolled row loop
            def row_body(b, carry):
                acc_ref[pl.ds(b, 1), :] += row_partial_sum(b)
                return carry
            lax.fori_loop(0, Bt, row_body, 0)

        # ---- finalize on the last HW tile: classifier + softmax -------------
        @pl.when(hw_i == pl.num_programs(1) - 1)
        def _finalize():
            pooled = acc_ref[...]                                      # (Bt, Chid); 1/HW folded into w2
            logits = jnp.dot(pooled, w2_ref[...],
                             preferred_element_type=jnp.float32) + b2_ref[...]
            z = logits - jnp.max(logits, axis=-1, keepdims=True)
            e = jnp.exp(z)
            denom = jnp.sum(e, axis=-1, keepdims=True)
            o_ref[...] = (e * pl.reciprocal(denom, approx=True)).astype(o_ref.dtype)

    # VMEM budget: double-buffered x tile + tiny weights + scratch; generation-aware cap.
    x_tile_bytes = Bt * C * thw * x.dtype.itemsize
    try:
        vmem_cap = pltpu.get_tpu_info().vmem_capacity_bytes
    except Exception:
        vmem_cap = 64 * 1024 * 1024                                    # conservative (v7x-sized)
    vmem_limit = int(min(vmem_cap // 2,
                         max(32 * 1024 * 1024, 3 * x_tile_bytes + (2 << 20))))

    out = pl.pallas_call(
        kernel,
        out_shape=jax.ShapeDtypeStruct((Bp, nclass), jnp.float32),
        grid_spec=pltpu.PrefetchScalarGridSpec(
            num_scalar_prefetch=0,
            grid=(grid_b, n_hw),                           # (batch tiles, HW reduction)
            in_specs=[
                pl.BlockSpec((Bt, C, thw), lambda bi, hi: (bi, 0, hi)),   # x (streamed)
                pl.BlockSpec((C, Chid), lambda bi, hi: (0, 0)),           # folded conv weight (f32)
                pl.BlockSpec((1, Chid), lambda bi, hi: (0, 0)),           # folded conv bias
                pl.BlockSpec((Chid, nclass), lambda bi, hi: (0, 0)),      # fc weight (1/HW folded)
                pl.BlockSpec((1, nclass), lambda bi, hi: (0, 0)),         # fc bias
            ],
            out_specs=pl.BlockSpec((Bt, nclass), lambda bi, hi: (bi, 0)),
            scratch_shapes=[pltpu.VMEM((Bt, Chid), jnp.float32)],         # pooled-sum accumulator
        ),
        compiler_params=pltpu.CompilerParams(
            dimension_semantics=("parallel", "arbitrary"),
            vmem_limit_bytes=vmem_limit,
        ),
    )(x, w1_eff, b1_eff, w2_eff, b2_eff)

    return out[:B]


def reference(x_nchw, mean, std, w1, b1, w2, b2):
    """Original-module semantics in f32: normalize -> 1x1 conv + ReLU -> GAP -> FC -> softmax."""
    B, C, H, W = x_nchw.shape
    x = x_nchw.reshape(B, C, H * W)
    x = (x - mean.reshape(1, C, 1)) / std.reshape(1, C, 1)
    h = jnp.einsum("ck,bcp->bkp", w1, x, precision=jax.lax.Precision.HIGHEST)
    h = jnp.maximum(h + b1.reshape(1, -1, 1), 0.0)
    pooled = jnp.mean(h, axis=-1)                                    # (B, Chid)
    logits = jnp.dot(pooled, w2, precision=jax.lax.Precision.HIGHEST) + b2.reshape(1, -1)
    return jax.nn.softmax(logits, axis=-1)


if __name__ == "__main__":
    B, C, H, W = 2, 4, 16, 16
    Chid, nclass = 32, 10

    key = jax.random.PRNGKey(0)
    kx, k1, k2, k3, k4 = jax.random.split(key, 5)

    x = jax.random.normal(kx, (B, C, H, W), dtype=jnp.float32)

    # deterministic "checkpoint"
    mean = jnp.linspace(0.4, 0.5, C, dtype=jnp.float32).reshape(1, C)
    std = jnp.linspace(0.2, 0.3, C, dtype=jnp.float32).reshape(1, C)
    w1 = jax.random.normal(k1, (C, Chid), dtype=jnp.float32) * 0.1
    b1 = jax.random.normal(k2, (1, Chid), dtype=jnp.float32) * 0.01
    w2 = jax.random.normal(k3, (Chid, nclass), dtype=jnp.float32) * 0.1
    b2 = jax.random.normal(k4, (1, nclass), dtype=jnp.float32) * 0.01

    ref = reference(x, mean, std, w1, b1, w2, b2)

    # f32 input, multi-step HW reduction exercised (hw_tile=128 -> 2 reduction steps).
    out_f32 = merge_model(x, mean, std, w1, b1, w2, b2, hw_tile=128)
    out_f32 = jax.block_until_ready(out_f32)
    assert out_f32.shape == (B, nclass)
    assert jnp.allclose(out_f32, ref, atol=3e-3, rtol=3e-3), "f32 kernel mismatch vs reference"

    # default tiling path (whole image in one grid step, single in-kernel chunk).
    out_one = merge_model(x, mean, std, w1, b1, w2, b2)
    out_one = jax.block_until_ready(out_one)
    assert jnp.allclose(out_one, ref, atol=3e-3, rtol=3e-3), "default-tile kernel mismatch"

    # "producer emits bf16" path: x is already bf16 in HBM, no wrapper-side cast.
    out_bf16 = merge_model(x.astype(jnp.bfloat16), mean, std, w1, b1, w2, b2, hw_tile=128)
    out_bf16 = jax.block_until_ready(out_bf16)
    assert out_bf16.shape == (B, nclass)
    assert jnp.allclose(out_bf16, ref, atol=1e-2, rtol=1e-2), "bf16 kernel mismatch vs reference"

    print("KERNEL_OK")
</pallas_src>

<mosaic_0001>
module attributes {stable_mosaic.version = 11 : i64} {
  func.func @kernel(%arg0: i32, %arg1: i32, %arg2: memref<2x4x128xf32, #tpu.memory_space<vmem>>, %arg3: memref<4x32xf32, #tpu.memory_space<vmem>>, %arg4: memref<1x32xf32, #tpu.memory_space<vmem>>, %arg5: memref<32x10xf32, #tpu.memory_space<vmem>>, %arg6: memref<1x10xf32, #tpu.memory_space<vmem>>, %arg7: memref<2x10xf32, #tpu.memory_space<vmem>>, %arg8: memref<2x32xf32, #tpu.memory_space<vmem>>) attributes {dimension_semantics = [#tpu.dimension_semantics<parallel>, #tpu.dimension_semantics<arbitrary>], iteration_bounds = array<i64: 1, 2>, scalar_prefetch = 0 : i64, scratch_operands = 1 : i64, tpu.core_type = #tpu.core_type<tc>, window_params = [{transform_indices = @transform_0, window_bounds = array<i64: 2, 4, 128>}, {pipeline_mode = #tpu.pipeline_mode<synchronous>, transform_indices = @transform_1, window_bounds = array<i64: 4, 32>}, {pipeline_mode = #tpu.pipeline_mode<synchronous>, transform_indices = @transform_2, window_bounds = array<i64: 1, 32>}, {pipeline_mode = #tpu.pipeline_mode<synchronous>, transform_indices = @transform_3, window_bounds = array<i64: 32, 10>}, {pipeline_mode = #tpu.pipeline_mode<synchronous>, transform_indices = @transform_4, window_bounds = array<i64: 1, 10>}, {transform_indices = @transform_5, window_bounds = array<i64: 2, 10>}]} {
    %c0_i32 = arith.constant 0 : i32
    %0 = arith.cmpi eq, %arg1, %c0_i32 : i32
    %1 = arith.extui %0 : i1 to i32
    %c0_i32_0 = arith.constant 0 : i32
    %2 = arith.cmpi ne, %1, %c0_i32_0 : i32
    scf.if %2 {
      %cst_25 = arith.constant 0.000000e+00 : f32
      %36 = vector.broadcast %cst_25 : f32 to vector<2x32xf32>
      %c0_26 = arith.constant 0 : index
      %c0_27 = arith.constant 0 : index
      %37 = vector.load %arg8[%c0_26, %c0_27] : memref<2x32xf32, #tpu.memory_space<vmem>>, vector<2x32xf32>
      tpu.vector_store %arg8[%c0_26, %c0_27], %36 {strides = array<i32>} : memref<2x32xf32, #tpu.memory_space<vmem>>, vector<2x32xf32>,
    } else {
    }
    %c0 = arith.constant 0 : index
    %c0_1 = arith.constant 0 : index
    %3 = vector.load %arg3[%c0, %c0_1] : memref<4x32xf32, #tpu.memory_space<vmem>>, vector<4x32xf32>
    %c0_2 = arith.constant 0 : index
    %c0_3 = arith.constant 0 : index
    %4 = vector.load %arg4[%c0_2, %c0_3] : memref<1x32xf32, #tpu.memory_space<vmem>>, vector<1x32xf32>
    %c0_4 = arith.constant 0 : index
    %c0_5 = arith.constant 0 : index
    %5 = vector.load %arg8[%c0_4, %c0_5] : memref<2x32xf32, #tpu.memory_space<vmem>>, vector<1x32xf32>
    %cst = arith.constant 0.000000e+00 : f32
    %6 = vector.broadcast %cst : f32 to vector<1x32xf32>
    %c0_6 = arith.constant 0 : index
    %c0_7 = arith.constant 0 : index
    %c0_8 = arith.constant 0 : index
    %7 = vector.load %arg2[%c0_6, %c0_7, %c0_8] : memref<2x4x128xf32, #tpu.memory_space<vmem>>, vector<1x4x128xf32>
    %8 = vector.shape_cast %7 : vector<1x4x128xf32> to vector<4x128xf32>
    %cst_9 = arith.constant dense<0.000000e+00> : vector<128x32xf32>
    %9 = tpu.matmul %8, %3, %cst_9 {dimension_numbers = #tpu.dot_dimension_numbers<[0], [0], [1], [1], [0, 1, 1, 1], [], []>} : vector<4x128xf32>, vector<4x32xf32>, vector<128x32xf32> -> vector<128x32xf32>
    %10 = vector.broadcast %4 : vector<1x32xf32> to vector<128x32xf32>
    %11 = arith.addf %9, %10 : vector<128x32xf32>
    %cst_10 = arith.constant 0.000000e+00 : f32
    %12 = vector.broadcast %cst_10 : f32 to vector<128x32xf32>
    %13 = arith.maximumf %11, %12 : vector<128x32xf32>
    %cst_11 = arith.constant dense<0.000000e+00> : vector<32xf32>
    %14 = vector.multi_reduction <add>, %13, %cst_11 [0] : vector<128x32xf32> to vector<32xf32>
    %15 = vector.shape_cast %14 : vector<32xf32> to vector<1x32xf32>
    %16 = arith.addf %6, %15 : vector<1x32xf32>
    %17 = arith.addf %5, %16 : vector<1x32xf32>
    %c0_12 = arith.constant 0 : index
    %c0_13 = arith.constant 0 : index
    %18 = vector.load %arg8[%c0_12, %c0_13] : memref<2x32xf32, #tpu.memory_space<vmem>>, vector<1x32xf32>
    tpu.vector_store %arg8[%c0_12, %c0_13], %17 {strides = array<i32>} : memref<2x32xf32, #tpu.memory_space<vmem>>, vector<1x32xf32>,
    %c1 = arith.constant 1 : index
    %c0_14 = arith.constant 0 : index
    %19 = vector.load %arg8[%c1, %c0_14] : memref<2x32xf32, #tpu.memory_space<vmem>>, vector<1x32xf32>
    %cst_15 = arith.constant 0.000000e+00 : f32
    %20 = vector.broadcast %cst_15 : f32 to vector<1x32xf32>
    %c1_16 = arith.constant 1 : index
    %c0_17 = arith.constant 0 : index
    %c0_18 = arith.constant 0 : index
    %21 = vector.load %arg2[%c1_16, %c0_17, %c0_18] : memref<2x4x128xf32, #tpu.memory_space<vmem>>, vector<1x4x128xf32>
    %22 = vector.shape_cast %21 : vector<1x4x128xf32> to vector<4x128xf32>
    %cst_19 = arith.constant dense<0.000000e+00> : vector<128x32xf32>
    %23 = tpu.matmul %22, %3, %cst_19 {dimension_numbers = #tpu.dot_dimension_numbers<[0], [0], [1], [1], [0, 1, 1, 1], [], []>} : vector<4x128xf32>, vector<4x32xf32>, vector<128x32xf32> -> vector<128x32xf32>
    %24 = vector.broadcast %4 : vector<1x32xf32> to vector<128x32xf32>
    %25 = arith.addf %23, %24 : vector<128x32xf32>
    %cst_20 = arith.constant 0.000000e+00 : f32
    %26 = vector.broadcast %cst_20 : f32 to vector<128x32xf32>
    %27 = arith.maximumf %25, %26 : vector<128x32xf32>
    %cst_21 = arith.constant dense<0.000000e+00> : vector<32xf32>
    %28 = vector.multi_reduction <add>, %27, %cst_21 [0] : vector<128x32xf32> to vector<32xf32>
    %29 = vector.shape_cast %28 : vector<32xf32> to vector<1x32xf32>
    %30 = arith.addf %20, %29 : vector<1x32xf32>
    %31 = arith.addf %19, %30 : vector<1x32xf32>
    %c1_22 = arith.constant 1 : index
    %c0_23 = arith.constant 0 : index
    %32 = vector.load %arg8[%c1_22, %c0_23] : memref<2x32xf32, #tpu.memory_space<vmem>>, vector<1x32xf32>
    tpu.vector_store %arg8[%c1_22, %c0_23], %31 {strides = array<i32>} : memref<2x32xf32, #tpu.memory_space<vmem>>, vector<1x32xf32>,
    %c1_i32 = arith.constant 1 : i32
    %33 = arith.cmpi eq, %arg1, %c1_i32 : i32
    %34 = arith.extui %33 : i1 to i32
    %c0_i32_24 = arith.constant 0 : i32
    %35 = arith.cmpi ne, %34, %c0_i32_24 : i32
    scf.if %35 {
      %c0_25 = arith.constant 0 : index
      %c0_26 = arith.constant 0 : index
      %36 = vector.load %arg8[%c0_25, %c0_26] : memref<2x32xf32, #tpu.memory_space<vmem>>, vector<2x32xf32>
      %c0_27 = arith.constant 0 : index
      %c0_28 = arith.constant 0 : index
      %37 = vector.load %arg5[%c0_27, %c0_28] : memref<32x10xf32, #tpu.memory_space<vmem>>, vector<32x10xf32>
      %cst_29 = arith.constant dense<0.000000e+00> : vector<2x10xf32>
      %38 = tpu.matmul %36, %37, %cst_29 {dimension_numbers = #tpu.dot_dimension_numbers<[1], [0], [0], [1], [0, 0, 1, 1], [], []>} : vector<2x32xf32>, vector<32x10xf32>, vector<2x10xf32> -> vector<2x10xf32>
      %c0_30 = arith.constant 0 : index
      %c0_31 = arith.constant 0 : index
      %39 = vector.load %arg6[%c0_30, %c0_31] : memref<1x10xf32, #tpu.memory_space<vmem>>, vector<1x10xf32>
      %40 = vector.broadcast %39 : vector<1x10xf32> to vector<2x10xf32>
      %41 = arith.addf %38, %40 : vector<2x10xf32>
      %cst_32 = arith.constant dense<0xFF800000> : vector<2xf32>
      %42 = vector.multi_reduction <maximumf>, %41, %cst_32 [1] : vector<2x10xf32> to vector<2xf32>
      %43 = vector.shape_cast %42 : vector<2xf32> to vector<2x1xf32>
      %44 = vector.broadcast %43 : vector<2x1xf32> to vector<2x10xf32>
      %45 = arith.subf %41, %44 : vector<2x10xf32>
      %46 = math.exp %45 : vector<2x10xf32>
      %cst_33 = arith.constant dense<0.000000e+00> : vector<2xf32>
      %47 = vector.multi_reduction <add>, %46, %cst_33 [1] : vector<2x10xf32> to vector<2xf32>
      %48 = vector.shape_cast %47 : vector<2xf32> to vector<2x1xf32>
      %49 = tpu.reciprocal %48 {approx = true} : vector<2x1xf32> -> vector<2x1xf32>
      %50 = vector.broadcast %49 : vector<2x1xf32> to vector<2x10xf32>
      %51 = arith.mulf %46, %50 : vector<2x10xf32>
      %c0_34 = arith.constant 0 : index
      %c0_35 = arith.constant 0 : index
      %52 = vector.load %arg7[%c0_34, %c0_35] : memref<2x10xf32, #tpu.memory_space<vmem>>, vector<2x10xf32>
      tpu.vector_store %arg7[%c0_34, %c0_35], %51 {strides = array<i32>} : memref<2x10xf32, #tpu.memory_space<vmem>>, vector<2x10xf32>,
    } else {
    }
    return
  }
  func.func @transform_0(%arg0: i32, %arg1: i32) -> (i32, i32, i32) {
    %c0_i32 = arith.constant 0 : i32
    %c0_i32_0 = arith.constant 0 : i32
    return %arg0, %c0_i32, %arg1 : i32, i32, i32
  }
  func.func @transform_1(%arg0: i32, %arg1: i32) -> (i32, i32) {
    %c0_i32 = arith.constant 0 : i32
    %c0_i32_0 = arith.constant 0 : i32
    %c0_i32_1 = arith.constant 0 : i32
    return %c0_i32, %c0_i32_0 : i32, i32
  }
  func.func @transform_2(%arg0: i32, %arg1: i32) -> (i32, i32) {
    %c0_i32 = arith.constant 0 : i32
    %c0_i32_0 = arith.constant 0 : i32
    %c0_i32_1 = arith.constant 0 : i32
    return %c0_i32, %c0_i32_0 : i32, i32
  }
  func.func @transform_3(%arg0: i32, %arg1: i32) -> (i32, i32) {
    %c0_i32 = arith.constant 0 : i32
    %c0_i32_0 = arith.constant 0 : i32
    %c0_i32_1 = arith.constant 0 : i32
    return %c0_i32, %c0_i32_0 : i32, i32
  }
  func.func @transform_4(%arg0: i32, %arg1: i32) -> (i32, i32) {
    %c0_i32 = arith.constant 0 : i32
    %c0_i32_0 = arith.constant 0 : i32
    %c0_i32_1 = arith.constant 0 : i32
    return %c0_i32, %c0_i32_0 : i32, i32
  }
  func.func @transform_5(%arg0: i32, %arg1: i32) -> (i32, i32) {
    %c0_i32 = arith.constant 0 : i32
    %c0_i32_0 = arith.constant 0 : i32
    return %arg0, %c0_i32 : i32, i32
  }
}

</mosaic_0001>

<bundles_post_ra>
// kernel: tpu_custom_call.1
= control target key start
LH: loop header
LB: loop body
LE: loop exit
PB: predicated region body
PF: predicated region fallthrough
CT: control target
= control target key end

     0   :  { %10 = vsyncpa [#allocation5], 0  ;;  %s1356_s18 = smov 0   ;;  %s1358_s19 = smov 0   ;;  %s1573_s0 = inlined_call_operand.vmem [shape: f32[2,4,256], index: 0, kind: input, shape index: {}]   ;;  %s1574_s1 = inlined_call_operand.vmem [shape: f32[4,32], index: 1, kind: input, shape index: {}]   ;;  %s1575_s2 = inlined_call_operand.vmem [shape: f32[1,32], index: 2, kind: input, shape index: {}]   ;;  %s1576_s3 = inlined_call_operand.vmem [shape: f32[32,10], index: 3, kind: input, shape index: {}]   ;;  %s1577_s4 = inlined_call_operand.vmem [shape: f32[1,10], index: 4, kind: input, shape index: {}]   ;;  %s1578_s5 = inlined_call_operand.hbm [shape: f32[2,10], index: 5, kind: output, shape index: {}]  }
   0x1   :  { %s1360_s20 = smov 0   ;;  %s1362_s21 = smov 0  }
   0x2   :  { %s1364_s22 = smov 0  }
   0x3 LB: > { %s1036_s23 = sadd.s32 4294967295, %s1319_s22   ;;  %s25_s24 = sadd.s32 1, %s1315_s21  ;;  %s1319_s22 = sphi %s1364_s22, %s16_s22   ;;  %s1315_s21 = sphi %s1362_s21, %s1583_s21   ;;  %s1311_s20 = sphi %s1360_s20, %s1582_s20   ;;  %s1307_s19 = sphi %s1358_s19, %s1581_s19   ;;  %s1303_s18 = sphi %s1356_s18, %s1580_s18  }
   0x4   : > { %p26_p0 = scmp.ge.s32.totalorder %s25_s24, 2  ;;  %p44_p1 = scmp.ne.s32.totalorder %s1307_s19, %s1303_s18 }
   0x5   : > { %p45_p2 = scmp.eq.s32.totalorder %s1319_s22, 0  ;;  %s37_s26 = sadd.s32 1, %s1307_s19 }
   0x6   : > { %s1585_s24 = smov (%p26_p0, %s25_s24), 0  ;;  %p1038_p5 = scmp.ge.s32.totalorder %s1319_s22, 2 }
   0x7   : > { %p46_p3 = por %p45_p2, %p44_p1  ;;  %s33_s25 = ssub.s32 %s1315_s21, %s1585_s24 }
   0x8   : > { %p35_p4 = scmp.eq.s32.totalorder %s33_s25, 0  ;;  %192 = sbr.rel (%p1038_p5) target bundleno = 22 (0x16), region = 32 }
   0xa   : > { %s1392_s27 = scalar_select %p35_p4, %s1307_s19, %s37_s26  }
   0xf   : > { %195 = sbr.rel (!%p46_p3) target bundleno = 22 (0x16), region = 36  ;;  %s197_s28 = sand.u32 (%p46_p3), 1, %s1307_s19  }
  0x10   : > { %s1040_s29 = sshll.u32 (%p46_p3), %s1315_s21, 2  ;;  %s1039_s30 = sshll.u32 (%p46_p3), %s197_s28, 3 }
  0x11   : > { %s204_s8 = scalar_lea.vmem (%p46_p3), %s1573_s0, %s1040_s29  ;;  %s199_s9 = scalar_lea.vmem (%p46_p3), [#allocation3], %s1039_s30 }
  0x12   : > { %v220_v0 = vld [vmem:[%s204_s8] sm:$0xf] (%p46_p3)  ;;  %v222_v1 = vld [vmem:[%s204_s8 + $0x8] sm:$0xf] (%p46_p3) }
  0x13   : > { %221 = vst [vmem:[%s199_s9] sm:$0xf] (%p46_p3), %v220_v0  ;;  %223 = vst [vmem:[%s199_s9 + $0x4] sm:$0xf] (%p46_p3), %v222_v1 }
  0x16 PF: > { %p1041_p6 = scmp.ge.s32.totalorder %s1319_s22, 1  ;;  %p249_p7 = scmp.lt.s32.totalorder %s1319_s22, 3 }
  0x18   : > { %p250_p8 = pnand %p1041_p6, %p249_p7 }
  0x19   : > { %s256_s10 = sand.u32 (!%p250_p8), 1, %s1303_s18   ;;  %p1043_p9 = scmp.ne.s32.totalorder (!%p250_p8), %s1311_s20, 0 }
  0x1a   : > { %253 = sbr.rel (%p250_p8) target bundleno = 1092 (0x444), region = 77  ;;  %s1042_s11 = sshll.u32 (!%p250_p8), %s256_s10, 3 }
  0x1b   : > { %s258_s12 = scalar_lea.vmem (!%p250_p8), [#allocation3], %s1042_s11 }
  0x21   : > { %282 = sbr.rel (%p1043_p9) target bundleno = 40 (0x28), region = 85  ;;  %vm283_vm0 = vcmask (!%p1043_p9), 254976   ;;  %v1321_v2 = vmov (!%p1043_p9), 0.0  }
  0x22   : > { %284 = vst.msk [vmem:[#allocation2] sm:$0x3] (!%p1043_p9), %vm283_vm0, %v1321_v2 }
  0x28 PF: > { %v288_v3 = vld [vmem:[%s258_s12] sm:$0xf]  ;;  %vm376_vm1 = vcmask 1043456   ;;  %v1062_v5 = vld [vmem:[%s258_s12 + $0x4] sm:$0xf]  ;;  %vm327_vm2 = vcmask 31744  }
  0x29   : > { %295 = vxpose.xlu0.b32.start.end [1/1] (short) %v288_v3, 128  ;;  %v285_v4 = vld [vmem:[%s1574_s1] sm:$0xf]  ;;  %vm541_vm3 = vcmask 261120   ;;  %vm581_vm4 = vcmask 253952   ;;  %p1080_p10 = scmp.ne.s32.totalorder %s1311_s20, 1 }
  0x2a   : > { %1126 = vmatprep.subr.msk.mxu0 %vm376_vm1, %v285_v4  ;;  %1152 = vmatprep.subr.msk.mxu1 %vm376_vm1, %v285_v4  ;;  %v1442_v38 = vld [vmem:[%s1575_s2] ss:$0 sm:$0xff]  ;;  %vm1323_vm5 = vmmov (!%p1080_p10), 0   ;;  %vm956_vm6 = vcmask (!%p1080_p10), 74752  }
  0x2b   : > { %1127 = vmatpush3.msk.msra.mxu0 %vm376_vm1, %v285_v4  ;;  %1153 = vmatpush3.msk.msra.mxu1 %vm376_vm1, %v285_v4 }
  0x66   : > { %586 = vxpose.xlu0.b32.start.end [1/1] (short) %v1062_v5, 128 }
  0xa9   : > { %v311_v6 = vpop.trf.xlu0 }
  0xaa   : > { %1128 = vmatprep.mubr.msk.f32.mxu0 %vm327_vm2, %v311_v6 }
  0xad   : > { %v312_v7 = vpop.trf.xlu0 }
  0xae   : > { %1129 = vmatmul.mubr.msk.f32.vlgmr.msra.gmra.mrb[0].mxu0 %vm327_vm2, %v312_v7 }
  0xb1   : > { %v313_v8 = vpop.trf.xlu0 }
  0xb2   : > { %1131 = vmatprep.mubr.msk.f32.mxu0 %vm327_vm2, %v313_v8 }
  0xb5   : > { %v314_v9 = vpop.trf.xlu0 }
  0xb6   : > { %1132 = vmatmul.mubr.msk.f32.gmra.mrb[2].mxu0 %vm327_vm2, %v314_v9 }
  0xb9   : > { %v315_v10 = vpop.trf.xlu0 }
  0xba   : > { %1134 = vmatprep.mubr.msk.f32.mxu0 %vm327_vm2, %v315_v10 }
  0xbd   : > { %v316_v11 = vpop.trf.xlu0 }
  0xbe   : > { %1135 = vmatmul.mubr.msk.f32.gmra.mrb[4].mxu0 %vm327_vm2, %v316_v11 }
  0xc1   : > { %v317_v12 = vpop.trf.xlu0 }
  0xc2   : > { %1137 = vmatprep.mubr.msk.f32.mxu0 %vm327_vm2, %v317_v12 }
  0xc5   : > { %v318_v13 = vpop.trf.xlu0 }
  0xc6   : > { %1138 = vmatmul.mubr.msk.f32.gmra.mrb[6].mxu0 %vm327_vm2, %v318_v13 }
  0xc9   : > { %v319_v14 = vpop.trf.xlu0 }
  0xca   : > { %1140 = vmatprep.mubr.msk.f32.mxu0 %vm327_vm2, %v319_v14 }
  0xcd   : > { %v320_v15 = vpop.trf.xlu0 }
  0xce   : > { %1141 = vmatmul.mubr.msk.f32.gmra.mrb[8].mxu0 %vm327_vm2, %v320_v15 }
  0xd1   : > { %v321_v16 = vpop.trf.xlu0 }
  0xd2   : > { %1143 = vmatprep.mubr.msk.f32.mxu0 %vm327_vm2, %v321_v16 }
  0xd5   : > { %v322_v17 = vpop.trf.xlu0 }
  0xd6   : > { %1144 = vmatmul.mubr.msk.f32.gmra.mrb[10].mxu0 %vm327_vm2, %v322_v17 }
  0xd9   : > { %v323_v18 = vpop.trf.xlu0 }
  0xda   : > { %1146 = vmatprep.mubr.msk.f32.mxu0 %vm327_vm2, %v323_v18 }
  0xdd   : > { %v324_v19 = vpop.trf.xlu0 }
  0xde   : > { %1147 = vmatmul.mubr.msk.f32.gmra.mrb[12].mxu0 %vm327_vm2, %v324_v19 }
  0xe1   : > { %v325_v20 = vpop.trf.xlu0 }
  0xe2   : > { %1149 = vmatprep.mubr.msk.f32.mxu0 %vm327_vm2, %v325_v20 }
  0xe5   : > { %v326_v21 = vpop.trf.xlu0 }
  0xe6   : > { %1150 = vmatmul.mubr.msk.f32.gmra.mrb[14].mxu0 %vm327_vm2, %v326_v21 }
  0xe9   : > { %v602_v22 = vpop.trf.xlu0 }
  0xea   : > { %1154 = vmatprep.mubr.msk.f32.mxu1 %vm327_vm2, %v602_v22 }
  0xed   : > { %v603_v23 = vpop.trf.xlu0 }
  0xee   : > { %1155 = vmatmul.mubr.msk.f32.vlgmr.msra.gmra.mrb[0].mxu1 %vm327_vm2, %v603_v23 }
  0xf1   : > { %v604_v24 = vpop.trf.xlu0 }
  0xf2   : > { %1157 = vmatprep.mubr.msk.f32.mxu1 %vm327_vm2, %v604_v24 }
  0xf5   : > { %v605_v25 = vpop.trf.xlu0 }
  0xf6   : > { %1158 = vmatmul.mubr.msk.f32.gmra.mrb[2].mxu1 %vm327_vm2, %v605_v25 }
  0xf9   : > { %v606_v26 = vpop.trf.xlu0 }
  0xfa   : > { %1160 = vmatprep.mubr.msk.f32.mxu1 %vm327_vm2, %v606_v26 }
  0xfd   : > { %v607_v27 = vpop.trf.xlu0 }
  0xfe   : > { %1161 = vmatmul.mubr.msk.f32.gmra.mrb[4].mxu1 %vm327_vm2, %v607_v27 }
 0x101   : > { %v608_v28 = vpop.trf.xlu0 }
 0x102   : > { %1163 = vmatprep.mubr.msk.f32.mxu1 %vm327_vm2, %v608_v28 }
 0x105   : > { %v609_v29 = vpop.trf.xlu0 }
 0x106   : > { %1164 = vmatmul.mubr.msk.f32.gmra.mrb[6].mxu1 %vm327_vm2, %v609_v29 }
 0x109   : > { %v610_v30 = vpop.trf.xlu0 }
 0x10a   : > { %1166 = vmatprep.mubr.msk.f32.mxu1 %vm327_vm2, %v610_v30 }
 0x10d   : > { %v611_v31 = vpop.trf.xlu0 }
 0x10e   : > { %1167 = vmatmul.mubr.msk.f32.gmra.mrb[8].mxu1 %vm327_vm2, %v611_v31 }
 0x111   : > { %v612_v32 = vpop.trf.xlu0 }
 0x112   : > { %1169 = vmatprep.mubr.msk.f32.mxu1 %vm327_vm2, %v612_v32 }
 0x115   : > { %v613_v33 = vpop.trf.xlu0 }
 0x116   : > { %1170 = vmatmul.mubr.msk.f32.gmra.mrb[10].mxu1 %vm327_vm2, %v613_v33 }
 0x119   : > { %v614_v34 = vpop.trf.xlu0 }
 0x11a   : > { %1172 = vmatprep.mubr.msk.f32.mxu1 %vm327_vm2, %v614_v34 }
 0x11d   : > { %v615_v35 = vpop.trf.xlu0 }
 0x11e   : > { %1173 = vmatmul.mubr.msk.f32.gmra.mrb[12].mxu1 %vm327_vm2, %v615_v35 }
 0x121   : > { %v616_v36 = vpop.trf.xlu0 }
 0x122   : > { %1175 = vmatprep.mubr.msk.f32.mxu1 %vm327_vm2, %v616_v36 }
 0x125   : > { %v617_v37 = vpop.trf.xlu0 }
 0x126   : > { %1176 = vmatmul.mubr.msk.f32.gmra.mrb[14].mxu1 %vm327_vm2, %v617_v37 }
 0x181   : > { %v1130_v39 = vpop.f32.mrb[0].mxu0 }
 0x182   : > { %v452_v40 = vadd.f32 %v1130_v39, %v1442_v38  ;;  %v446_v41 = vpop.f32.mrb[1].mxu0 }
 0x183   : > { %v447_v42 = vadd.f32 %v1442_v38, %v446_v41 }
 0x184   : > { %v526_v43 = vmax.f32 %v452_v40, 0.0 }
 0x185   : > { %v525_v44 = vmax.f32 %v447_v42, 0.0 }
 0x186   : > { %v543_v45 = vsel %vm541_vm3, %v526_v43, 0.0 }
 0x187   : > { %v542_v46 = vsel %vm541_vm3, %v525_v44, 0.0 }
 0x188   : > { %v544_v47 = vadd.f32 %v543_v45, %v542_v46 }
 0x189   : > { %v1133_v48 = vpop.f32.mrb[2].mxu0 }
 0x18a   : > { %v462_v49 = vadd.f32 %v1133_v48, %v1442_v38  ;;  %v456_v50 = vpop.f32.mrb[3].mxu0 }
 0x18b   : > { %v457_v51 = vadd.f32 %v1442_v38, %v456_v50 }
 0x18c   : > { %v528_v52 = vmax.f32 %v462_v49, 0.0 }
 0x18d   : > { %v527_v53 = vmax.f32 %v457_v51, 0.0 }
 0x18e   : > { %v547_v56 = vsel %vm541_vm3, %v528_v52, 0.0 }
 0x18f   : > { %v545_v54 = vsel %vm541_vm3, %v527_v53, 0.0 }
 0x190   : > { %v546_v55 = vadd.f32 %v545_v54, %v544_v47 }
 0x191   : > { %v1136_v57 = vpop.f32.mrb[4].mxu0 }
 0x192   : > { %v472_v58 = vadd.f32 %v1136_v57, %v1442_v38  ;;  %v466_v59 = vpop.f32.mrb[5].mxu0  ;;  %v548_v60 = vadd.f32 %v547_v56, %v546_v55 }
 0x193   : > { %v467_v61 = vadd.f32 %v1442_v38, %v466_v59 }
 0x194   : > { %v530_v62 = vmax.f32 %v472_v58, 0.0 }
 0x195   : > { %v529_v63 = vmax.f32 %v467_v61, 0.0 }
 0x196   : > { %v551_v2 = vsel %vm541_vm3, %v530_v62, 0.0 }
 0x197   : > { %v549_v0 = vsel %vm541_vm3, %v529_v63, 0.0 }
 0x198   : > { %v550_v1 = vadd.f32 %v549_v0, %v548_v60 }
 0x199   : > { %v1139_v3 = vpop.f32.mrb[6].mxu0 }
 0x19a   : > { %v482_v4 = vadd.f32 %v1139_v3, %v1442_v38  ;;  %v476_v5 = vpop.f32.mrb[7].mxu0  ;;  %v552_v6 = vadd.f32 %v551_v2, %v550_v1 }
 0x19b   : > { %v477_v7 = vadd.f32 %v1442_v38, %v476_v5 }
 0x19c   : > { %v532_v8 = vmax.f32 %v482_v4, 0.0 }
 0x19d   : > { %v531_v9 = vmax.f32 %v477_v7, 0.0 }
 0x19e   : > { %v555_v12 = vsel %vm541_vm3, %v532_v8, 0.0 }
 0x19f   : > { %v553_v10 = vsel %vm541_vm3, %v531_v9, 0.0  ;;  %v287_v9 = vld [vmem:[#allocation2] sm:$0x1] }
 0x1a0   : > { %v554_v11 = vadd.f32 %v553_v10, %v552_v6 }
 0x1a1   : > { %v1142_v13 = vpop.f32.mrb[8].mxu0 }
 0x1a2   : > { %v492_v14 = vadd.f32 %v1142_v13, %v1442_v38  ;;  %v486_v15 = vpop.f32.mrb[9].mxu0  ;;  %v556_v16 = vadd.f32 %v555_v12, %v554_v11 }
 0x1a3   : > { %v487_v17 = vadd.f32 %v1442_v38, %v486_v15 }
 0x1a4   : > { %v534_v18 = vmax.f32 %v492_v14, 0.0 }
 0x1a5   : > { %v533_v19 = vmax.f32 %v487_v17, 0.0 }
 0x1a6   : > { %v559_v22 = vsel %vm541_vm3, %v534_v18, 0.0 }
 0x1a7   : > { %v557_v20 = vsel %vm541_vm3, %v533_v19, 0.0 }
 0x1a8   : > { %v558_v21 = vadd.f32 %v557_v20, %v556_v16 }
 0x1a9   : > { %v1145_v23 = vpop.f32.mrb[10].mxu0 }
 0x1aa   : > { %v502_v24 = vadd.f32 %v1145_v23, %v1442_v38  ;;  %v496_v25 = vpop.f32.mrb[11].mxu0  ;;  %v560_v26 = vadd.f32 %v559_v22, %v558_v21 }
 0x1ab   : > { %v497_v27 = vadd.f32 %v1442_v38, %v496_v25 }
 0x1ac   : > { %v536_v28 = vmax.f32 %v502_v24, 0.0 }
 0x1ad   : > { %v535_v29 = vmax.f32 %v497_v27, 0.0 }
 0x1ae   : > { %v563_v32 = vsel %vm541_vm3, %v536_v28, 0.0 }
 0x1af   : > { %v561_v30 = vsel %vm541_vm3, %v535_v29, 0.0 }
 0x1b0   : > { %v562_v31 = vadd.f32 %v561_v30, %v560_v26 }
 0x1b1   : > { %v1148_v33 = vpop.f32.mrb[12].mxu0 }
 0x1b2   : > { %v512_v34 = vadd.f32 %v1148_v33, %v1442_v38  ;;  %v506_v35 = vpop.f32.mrb[13].mxu0  ;;  %v564_v36 = vadd.f32 %v563_v32, %v562_v31 }
 0x1b3   : > { %v507_v37 = vadd.f32 %v1442_v38, %v506_v35 }
 0x1b4   : > { %v538_v39 = vmax.f32 %v512_v34, 0.0 }
 0x1b5   : > { %v537_v40 = vmax.f32 %v507_v37, 0.0 }
 0x1b6   : > { %v567_v43 = vsel %vm541_vm3, %v538_v39, 0.0 }
 0x1b7   : > { %v565_v41 = vsel %vm541_vm3, %v537_v40, 0.0 }
 0x1b8   : > { %v566_v42 = vadd.f32 %v565_v41, %v564_v36 }
 0x1b9   : > { %v1151_v44 = vpop.f32.mrb[14].mxu0 }
 0x1ba   : > { %v522_v45 = vadd.f32 %v1151_v44, %v1442_v38  ;;  %v516_v46 = vpop.f32.mrb[15].mxu0  ;;  %v568_v47 = vadd.f32 %v567_v43, %v566_v42 }
 0x1bb   : > { %v517_v48 = vadd.f32 %v1442_v38, %v516_v46 }
 0x1bc   : > { %v540_v49 = vmax.f32 %v522_v45, 0.0 }
 0x1bd   : > { %v539_v50 = vmax.f32 %v517_v48, 0.0 }
 0x1be   : > { %v571_v53 = vsel %vm541_vm3, %v540_v49, 0.0 }
 0x1bf   : > { %v569_v51 = vsel %vm541_vm3, %v539_v50, 0.0 }
 0x1c0   : > { %v570_v52 = vadd.f32 %v569_v51, %v568_v47 }
 0x1c1   : > { %v1156_v54 = vpop.f32.mrb[0].mxu1 }
 0x1c2   : > { %v572_v55 = vadd.f32 %v571_v53, %v570_v52  ;;  %v738_v56 = vadd.f32 %v1156_v54, %v1442_v38  ;;  %v732_v57 = vpop.f32.mrb[1].mxu1 }
 0x1c3   : > { %v733_v58 = vadd.f32 %v1442_v38, %v732_v57 }
 0x1c4   : > { %v573_v59 = vrot.slane %v572_v55, 4  ;;  %v812_v60 = vmax.f32 %v738_v56, 0.0 }
 0x1c5   : > { %v811_v61 = vmax.f32 %v733_v58, 0.0 }
 0x1c6   : > { %v574_v62 = vadd.f32 %v573_v59, %v572_v55  ;;  %v828_v63 = vsel %vm541_vm3, %v812_v60, 0.0 }
 0x1c7   : > { %v827_v0 = vsel %vm541_vm3, %v811_v61, 0.0 }
 0x1c8   : > { %v575_v1 = vrot.slane %v574_v62, 2  ;;  %v829_v2 = vadd.f32 %v828_v63, %v827_v0 }
 0x1c9   : > { %v1159_v3 = vpop.f32.mrb[2].mxu1 }
 0x1ca   : > { %v576_v4 = vadd.f32 %v575_v1, %v574_v62  ;;  %v748_v5 = vadd.f32 %v1159_v3, %v1442_v38  ;;  %v742_v6 = vpop.f32.mrb[3].mxu1 }
 0x1cb   : > { %v743_v7 = vadd.f32 %v1442_v38, %v742_v6 }
 0x1cc   : > { %v577_v8 = vrot.slane %v576_v4, 1  ;;  %v814_v10 = vmax.f32 %v748_v5, 0.0 }
 0x1cd   : > { %v813_v11 = vmax.f32 %v743_v7, 0.0 }
 0x1ce   : > { %v578_v12 = vadd.f32 %v577_v8, %v576_v4  ;;  %v832_v16 = vsel %vm541_vm3, %v814_v10, 0.0 }
 0x1cf   : > { %v830_v13 = vsel %vm541_vm3, %v813_v11, 0.0 }
 0x1d0   : > { %v580_v14 = vadd.f32 %v578_v12, %v287_v9  ;;  %v831_v15 = vadd.f32 %v830_v13, %v829_v2 }
 0x1d1   : > { %v1162_v17 = vpop.f32.mrb[4].mxu1 }
 0x1d2   : > { %582 = vst.msk [vmem:[#allocation2] sm:$0x1] %vm581_vm4, %v580_v14  ;;  %v758_v18 = vadd.f32 %v1162_v17, %v1442_v38  ;;  %v752_v19 = vpop.f32.mrb[5].mxu1  ;;  %v833_v20 = vadd.f32 %v832_v16, %v831_v15 }
 0x1d3   : > { %v753_v21 = vadd.f32 %v1442_v38, %v752_v19 }
 0x1d4   : > { %v816_v22 = vmax.f32 %v758_v18, 0.0 }
 0x1d5   : > { %v815_v23 = vmax.f32 %v753_v21, 0.0 }
 0x1d6   : > { %v836_v26 = vsel %vm541_vm3, %v816_v22, 0.0 }
 0x1d7   : > { %v834_v24 = vsel %vm541_vm3, %v815_v23, 0.0  ;;  %v873_v23 = vld [vmem:[%s1576_s3 + $0x8] sm:$0xff] (!%p1080_p10) }
 0x1d8   : > { %v835_v25 = vadd.f32 %v834_v24, %v833_v20  ;;  %v583_v20 = vld [vmem:[#allocation2 + $0x1] sm:$0x1]  ;;  %v874_v24 = vld [vmem:[%s1576_s3 + $0x10] sm:$0xff] (!%p1080_p10) }
 0x1d9   : > { %v1165_v27 = vpop.f32.mrb[6].mxu1 }
 0x1da   : > { %v768_v28 = vadd.f32 %v1165_v27, %v1442_v38  ;;  %v762_v29 = vpop.f32.mrb[7].mxu1  ;;  %v837_v30 = vadd.f32 %v836_v26, %v835_v25  ;;  %v1322_v25 = vmov (!%p1080_p10), 0.0|0.0   ;;  %v875_v27 = vld [vmem:[%s1576_s3 + $0x18] sm:$0xff] (!%p1080_p10) }
 0x1db   : > { %v763_v31 = vadd.f32 %v1442_v38, %v762_v29  ;;  %1189 = vmatprep.subr.bf16.mxu0 (!%p1080_p10), %v1322_v25  ;;  %v1193_v29 = vpack.c.bf16 (!%p1080_p10), %v875_v27, %v874_v24 }
 0x1dc   : > { %v818_v32 = vmax.f32 %v768_v28, 0.0  ;;  %v1324_v28 = vmov (!%p1080_p10), 0.0  }
 0x1dd   : > { %v817_v33 = vmax.f32 %v763_v31, 0.0  ;;  %1186 = vmatprep.mubr.msk.f32.mxu0 (!%p1080_p10), %vm1323_vm5, %v1324_v28  ;;  %v1081_v31 = vld [vmem:[%s1577_s4] ss:$0 sm:$0xff] (!%p1080_p10) }
 0x1de   : > { %v840_v36 = vsel %vm541_vm3, %v818_v32, 0.0 }
 0x1df   : > { %v838_v34 = vsel %vm541_vm3, %v817_v33, 0.0 }
 0x1e0   : > { %v839_v35 = vadd.f32 %v838_v34, %v837_v30 }
 0x1e1   : > { %v1168_v37 = vpop.f32.mrb[8].mxu1 }
 0x1e2   : > { %v778_v39 = vadd.f32 %v1168_v37, %v1442_v38  ;;  %v772_v40 = vpop.f32.mrb[9].mxu1  ;;  %v841_v41 = vadd.f32 %v840_v36, %v839_v35 }
 0x1e3   : > { %v773_v42 = vadd.f32 %v1442_v38, %v772_v40 }
 0x1e4   : > { %v820_v43 = vmax.f32 %v778_v39, 0.0 }
 0x1e5   : > { %v819_v44 = vmax.f32 %v773_v42, 0.0 }
 0x1e6   : > { %v844_v47 = vsel %vm541_vm3, %v820_v43, 0.0 }
 0x1e7   : > { %v842_v45 = vsel %vm541_vm3, %v819_v44, 0.0 }
 0x1e8   : > { %v843_v46 = vadd.f32 %v842_v45, %v841_v41 }
 0x1e9   : > { %v1171_v48 = vpop.f32.mrb[10].mxu1 }
 0x1ea   : > { %v788_v49 = vadd.f32 %v1171_v48, %v1442_v38  ;;  %v782_v50 = vpop.f32.mrb[11].mxu1  ;;  %v845_v51 = vadd.f32 %v844_v47, %v843_v46 }
 0x1eb   : > { %v783_v52 = vadd.f32 %v1442_v38, %v782_v50 }
 0x1ec   : > { %v822_v53 = vmax.f32 %v788_v49, 0.0 }
 0x1ed   : > { %v821_v54 = vmax.f32 %v783_v52, 0.0 }
 0x1ee   : > { %v848_v57 = vsel %vm541_vm3, %v822_v53, 0.0 }
 0x1ef   : > { %v846_v55 = vsel %vm541_vm3, %v821_v54, 0.0 }
 0x1f0   : > { %v847_v56 = vadd.f32 %v846_v55, %v845_v51 }
 0x1f1   : > { %v1174_v58 = vpop.f32.mrb[12].mxu1 }
 0x1f2   : > { %v798_v59 = vadd.f32 %v1174_v58, %v1442_v38  ;;  %v792_v60 = vpop.f32.mrb[13].mxu1  ;;  %v849_v61 = vadd.f32 %v848_v57, %v847_v56 }
 0x1f3   : > { %v793_v62 = vadd.f32 %v1442_v38, %v792_v60 }
 0x1f4   : > { %v824_v63 = vmax.f32 %v798_v59, 0.0 }
 0x1f5   : > { %v823_v0 = vmax.f32 %v793_v62, 0.0 }
 0x1f6   : > { %v852_v3 = vsel %vm541_vm3, %v824_v63, 0.0 }
 0x1f7   : > { %v850_v1 = vsel %vm541_vm3, %v823_v0, 0.0 }
 0x1f8   : > { %v851_v2 = vadd.f32 %v850_v1, %v849_v61 }
 0x1f9   : > { %v1177_v4 = vpop.f32.mrb[14].mxu1 }
 0x1fa   : > { %v808_v5 = vadd.f32 %v1177_v4, %v1442_v38  ;;  %v802_v6 = vpop.f32.mrb[15].mxu1  ;;  %v853_v7 = vadd.f32 %v852_v3, %v851_v2 }
 0x1fb   : > { %v803_v8 = vadd.f32 %v1442_v38, %v802_v6  ;;  %v872_v38 = vld [vmem:[%s1576_s3] sm:$0xff] (!%p1080_p10) }
 0x1fc   : > { %v826_v9 = vmax.f32 %v808_v5, 0.0  ;;  %v1190_v26 = vpack.c.bf16 (!%p1080_p10), %v873_v23, %v872_v38 }
 0x1fd   : > { %v825_v10 = vmax.f32 %v803_v8, 0.0 }
 0x1fe   : > { %v856_v13 = vsel %vm541_vm3, %v826_v9, 0.0  ;;  %1191 = vmatpush3.bf16.msra.mxu0 (!%p1080_p10), %v1190_v26 }
 0x1ff   : > { %v854_v11 = vsel %vm541_vm3, %v825_v10, 0.0  ;;  %1192 = vmatprep.subr.bf16.mxu0 (!%p1080_p10), %v1322_v25 }
 0x200   : > { %v855_v12 = vadd.f32 %v854_v11, %v853_v7 }
 0x202   : > { %v857_v14 = vadd.f32 %v856_v13, %v855_v12  ;;  %1194 = vmatpush3.bf16.msra.mxu0 (!%p1080_p10), %v1193_v29 }
 0x204   : > { %v858_v15 = vrot.slane %v857_v14, 4 }
 0x206   : > { %v859_v16 = vadd.f32 %v858_v15, %v857_v14 }
 0x208   : > { %v860_v17 = vrot.slane %v859_v16, 2 }
 0x20a   : > { %v861_v18 = vadd.f32 %v860_v17, %v859_v16 }
 0x20c   : > { %v862_v19 = vrot.slane %v861_v18, 1  ;;  %870 = sbr.rel (%p1080_p10) target bundleno = 1067 (0x42b), region = 89 }
 0x20e   : > { %v863_v21 = vadd.f32 %v862_v19, %v861_v18 }
 0x210   : > { %v865_v22 = vadd.f32 %v863_v21, %v583_v20 }
 0x212   : > { %866 = vst.msk [vmem:[#allocation2 + $0x1] sm:$0x1] %vm581_vm4, %v865_v22 }
 0x219   : > { %v871_v30 = vld [vmem:[#allocation2] sm:$0x3] }
 0x21a   : > { %1187 = vmatmul.mubr.msk.f32.vlgmr.msra.gmra.mrb[0].mxu0 %vm541_vm3, %v871_v30 }
 0x2ed   : > { %v952_v32 = vpop.f32.mrb[0].mxu0 }
 0x2ee   : > { %v953_v33 = vadd.f32 %v1081_v31, %v952_v32  ;;  %v1188_v34 = vpop.f32.mrb[1].mxu0 }
 0x2f0   : > { %v957_v35 = vsel %vm956_vm6, %v953_v33, -inf }
 0x2f1   : > { %958 = vmax.xlane.f32.xlu0 %v957_v35 }
 0x37e   : > { %v959_v36 = vpop.xlane.xlu0 %958 }
 0x37f   : > { %v960_v37 = vsub.f32 %v953_v33, %v959_v36 }
 0x381   : > { %v961_v39 = vmul.f32 1.442695, %v960_v37 }
 0x383   : > { %1247 = vpow2.f32 %v961_v39 }
 0x38d   : > { %v1248_v40 = vpop.eup %1247 }
 0x38e   : > { %v963_v41 = vsel %vm956_vm6, %v1248_v40, 0.0 }
 0x38f   : > { %964 = vadd.xlane.f32.xlu0 %v963_v41 }
 0x41c   : > { %v965_v42 = vpop.xlane.xlu0 %964 }
 0x41d   : > { %1249 = vrcp.f32 %v965_v42 }
 0x427   : > { %v1250_v43 = vpop.eup %1249 }
 0x428   : > { %v967_v44 = vmul.f32 %v1250_v43, %v1248_v40 }
 0x42a   : > { %968 = vst.msk [vmem:[#allocation4] sm:$0x3] %vm956_vm6, %v967_v44 }
 0x42b PF: > { %p1532_p11 = scmp.eq.s32.totalorder %s1036_s23, 1  ;;  %s1325_s9 = smov [#allocation4]  }
 0x42c   : > { %s978_s10 = sshll.u32 %s1325_s9, 4  ;;  %s979_s10 = int_to_ptr.vmem [resolvable:$true] %s978_s10 }
 0x42d   : > { %s1251_s11 = scalar_lea.vmem %s979_s10, 32  ;;  %p1258_p1 = scmp.lt.s32.totalorder %s979_s10, %s979_s10 }
 0x42e   : > { %p1252_p12 = scmp.ne.s32.totalorder %s979_s10, %s1251_s11  ;;  %p1259_p2 = scmp.lt.s32.totalorder %s1251_s11, %s1251_s11 }
 0x430   : > { %p1253_p13 = pnand %p1252_p12, %p1532_p11  ;;  %p1260_p3 = por %p1259_p2, %p1258_p1 }
 0x432   : > { %p1254_p0 = pneg %p1253_p13 }
 0x434   : > { %p1261_p4 = pnand %p1260_p3, %p1254_p0 }
 0x436   : > { %1264 = shalt.err (!%p1261_p4)
}
 0x437   : > { %s1265_s23 = scalar_lea.hbm %s1578_s5, 32 }
 0x438   : > { %p1266_p5 = scmp.ne.s32.totalorder %s1578_s5, %s1265_s23  ;;  %p1271_p8 = scmp.lt.u32.totalorder %s1265_s23, %s1578_s5 }
 0x43a   : > { %p1267_p6 = pnand %p1266_p5, %p1532_p11 }
 0x43c   : > { %p1268_p7 = pneg %p1267_p6 }
 0x43e   : > { %p1273_p9 = pnand %p1271_p8, %p1268_p7 }
 0x440   : > { %1276 = shalt.err (!%p1273_p9)
}
 0x441   : > { %1196 = dma.vmem_to_hbm [thread:$0]  (%p1532_p11), %s979_s10, 32, %s1578_s5, [#allocation5]  }
 0x442   : > { %1298 = dma.done.wait (%p1532_p11), [#allocation5], 32  }
 0x443   : > { %1300 = vsyncadd (%p1532_p11), [#allocation5], 4294967264 }
 0x444 PF: > { %s16_s22 = sadd.s32 1, %s1319_s22   ;;  %s1580_s18 = smov %s1307_s19 }
 0x445   : > { %p13_p10 = scmp.ge.s32.totalorder %s16_s22, 4   ;;  %s1581_s19 = smov %s1392_s27 }
 0x446   : > { %s1582_s20 = smov %s1315_s21  ;;  %s1583_s21 = smov %s1585_s24 }
 0x447   :  { %15 = sbr.rel (!%p13_p10) target bundleno = 3 (0x3), region = 123 }
 0x44e   :  { %991 = vsyncpa [#allocation5], 1 }
 0x44f   :  { %993 = vsyncpa [#allocation5 + $0x1], 1 }

</bundles_post_ra>
